<compile_context>
chip_gen: v7x
topology: tpu7x:2x2x1
jax: 0.10.0
libtpu: 0.0.40
codegen_flags: <defaults>
</compile_context>

<pallas_src>
import functools
import math

import jax
import jax.numpy as jnp
from jax import lax
from jax.experimental import pallas as pl
from jax.experimental.pallas import tpu as pltpu


def _round_up(x, m):
    return ((x + m - 1) // m) * m


def _gelu(h, approximate):
    if approximate:
        # tanh-approx GELU: tanh goes to the EUP (its own VLIW slot) and
        # overlaps for free with MXU/VPU work.
        c = jnp.float32(math.sqrt(2.0 / math.pi))
        return 0.5 * h * (1.0 + jnp.tanh(c * (h + jnp.float32(0.044715) * h * h * h)))
    # exact erf GELU (matches PyTorch F.gelu default)
    return 0.5 * h * (1.0 + lax.erf(h * jnp.float32(1.0 / math.sqrt(2.0))))


# ----------------------------------------------------------------------------
# Kernels
# ----------------------------------------------------------------------------
def _ffn_kernel_resident(x_ref, w1_ref, b1_ref, w2_ref, b2_ref, o_ref, *,
                         approximate_gelu):
    """Single-F-block fast path: full weights are VMEM-resident, no accumulator."""
    h = jnp.dot(x_ref[...], w1_ref[...], preferred_element_type=jnp.float32)
    h = h + b1_ref[...]
    g = _gelu(h, approximate_gelu)
    y = jnp.dot(g.astype(w2_ref.dtype), w2_ref[...],
                preferred_element_type=jnp.float32)
    o_ref[...] = (y + b2_ref[...]).astype(o_ref.dtype)


def _ffn_kernel_tiled(x_ref, w1_ref, b1_ref, w2_ref, b2_ref, o_ref, acc_ref, *,
                      approximate_gelu):
    """F-tiled path: f32 VMEM accumulator over the d_ff grid axis."""
    j = pl.program_id(1)

    # conv1 slice: (tm, H) @ (H, tf), f32 accumulate on the MXU.
    h = jnp.dot(x_ref[...], w1_ref[...], preferred_element_type=jnp.float32)
    h = h + b1_ref[...]
    g = _gelu(h, approximate_gelu)

    # conv2 partial product over this d_ff slice.
    part = jnp.dot(g.astype(w2_ref.dtype), w2_ref[...],
                   preferred_element_type=jnp.float32)

    @pl.when(j == 0)
    def _first():
        # Write directly: saves a (tm,H) f32 zero-store + add pass per i-tile.
        acc_ref[...] = part

    @pl.when(j > 0)
    def _accum():
        acc_ref[...] += part

    @pl.when(j == pl.num_programs(1) - 1)
    def _finalize():
        # TODO(synk): training-mode dropout not applied; this is eval-mode
        # (identity) dropout, matching module.eval().
        o_ref[...] = (acc_ref[...] + b2_ref[...]).astype(o_ref.dtype)


# ----------------------------------------------------------------------------
# Tile / VMEM selection (generation-aware)
# ----------------------------------------------------------------------------
def _device_config():
    """Return (vmem_limit_bytes, tm0, tf0, multi_core) based on the TPU generation."""
    try:
        cap = int(pltpu.get_tpu_info().vmem_capacity_bytes)
    except Exception:
        cap = 64 * 1024 * 1024  # conservative fallback (fits every generation)
    if cap >= 100 * 1024 * 1024:
        # 128 MiB parts (v5e / v6e): big row tiles + wide d_ff tiles.
        return 100 * 1024 * 1024, 640, 1024, False
    # 64 MiB part (v7x, 2 TCs): tm up, tf down, stay well under physical VMEM.
    return 54 * 1024 * 1024, 512, 256, True


def _vmem_bytes(tm, tf, H, cbytes, obytes, n_j):
    """Rough double-buffered VMEM footprint estimate for one grid step."""
    dbl = 2
    x_b = dbl * tm * H * cbytes
    w1_b = dbl * H * tf * cbytes
    w2_b = dbl * tf * H * cbytes
    b1_b = dbl * 8 * tf * 4
    b2_b = dbl * 8 * H * 4
    out_b = dbl * tm * H * obytes
    acc_b = tm * H * 4 if n_j > 1 else 0
    tmp_b = 2 * tm * tf * 4  # h / gelu(h) f32 temporaries
    return x_b + w1_b + w2_b + b1_b + b2_b + out_b + acc_b + tmp_b


# ----------------------------------------------------------------------------
# Wrapper
# ----------------------------------------------------------------------------
def poswise_ffn(x, w1, b1, w2, b2, *, tm=None, tf=None,
                compute_dtype=jnp.bfloat16, out_dtype=None,
                approximate_gelu=False):
    """x: (B, S, H). w1: (H, F), b1: (F,), w2: (F, H), b2: (H,). Returns (B, S, H)."""
    B, S, H = x.shape
    Hw, F = w1.shape
    assert Hw == H and w2.shape == (F, H)
    M = B * S

    out_dtype = x.dtype if out_dtype is None else out_dtype
    cbytes = jnp.dtype(compute_dtype).itemsize
    obytes = jnp.dtype(out_dtype).itemsize

    vmem_limit, tm0, tf0, multi_core = _device_config()
    tm = tm0 if tm is None else tm
    tf = tf0 if tf is None else tf

    # Clamp tiles to the problem size, keep sublane/lane alignment.
    tm = min(tm, _round_up(M, 8))
    tf = min(tf, _round_up(F, 128))

    # On 2-TC parts, avoid a single giant row tile for medium M shapes so both
    # cores get work (the M axis is marked "parallel").
    if multi_core and M >= 256 and _round_up(M, tm) // tm == 1:
        tm = _round_up((M + 1) // 2, 8)

    budget = int(vmem_limit * 0.9)
    Fp_full = _round_up(F, 128)

    # Resident-weights fast path: both (padded) weights fit VMEM -> single F
    # block, weights fetched once, no accumulator scratch.
    if _vmem_bytes(tm, Fp_full, H, cbytes, obytes, n_j=1) <= budget:
        tf = Fp_full
    else:
        # Shrink tf (then tm) until the tiled configuration fits the budget.
        while tf > 128 and _vmem_bytes(tm, tf, H, cbytes, obytes, n_j=2) > budget:
            tf = max(128, tf // 2)
        while tm > 8 and _vmem_bytes(tm, tf, H, cbytes, obytes, n_j=2) > budget:
            tm = max(8, _round_up(tm // 2, 8))

    Mp = _round_up(M, tm)
    Fp = _round_up(F, tf)
    grid_i = Mp // tm
    n_j = Fp // tf

    # Wrapper-side casts (no per-step VPU casts inside the kernel).
    x2d = x.reshape(M, H).astype(compute_dtype)
    if Mp != M:
        x2d = jnp.pad(x2d, ((0, Mp - M), (0, 0)))

    w1c = w1.astype(compute_dtype)
    w2c = w2.astype(compute_dtype)
    b1c = b1.reshape(1, F).astype(jnp.float32)
    if Fp != F:
        # Zero-padded F columns give gelu(0)=0 and zero W2 rows -> exact.
        w1c = jnp.pad(w1c, ((0, 0), (0, Fp - F)))
        b1c = jnp.pad(b1c, ((0, 0), (0, Fp - F)))
        w2c = jnp.pad(w2c, ((0, Fp - F), (0, 0)))
    b2c = b2.reshape(1, H).astype(jnp.float32)

    if n_j == 1:
        kernel = functools.partial(_ffn_kernel_resident,
                                   approximate_gelu=approximate_gelu)
        grid = (grid_i,)
        in_specs = [
            pl.BlockSpec((tm, H), lambda i: (i, 0)),    # activation row tile
            pl.BlockSpec((H, Fp), lambda i: (0, 0)),    # W1 (resident)
            pl.BlockSpec((1, Fp), lambda i: (0, 0)),    # b1 (resident)
            pl.BlockSpec((Fp, H), lambda i: (0, 0)),    # W2 (resident)
            pl.BlockSpec((1, H), lambda i: (0, 0)),     # b2 (resident)
        ]
        out_specs = pl.BlockSpec((tm, H), lambda i: (i, 0))
        scratch_shapes = []
        dim_sems = ("parallel",)
    else:
        kernel = functools.partial(_ffn_kernel_tiled,
                                   approximate_gelu=approximate_gelu)
        grid = (grid_i, n_j)
        in_specs = [
            pl.BlockSpec((tm, H), lambda i, j: (i, 0)),   # activation row tile
            pl.BlockSpec((H, tf), lambda i, j: (0, j)),   # W1 d_ff slice
            pl.BlockSpec((1, tf), lambda i, j: (0, j)),   # b1 d_ff slice
            pl.BlockSpec((tf, H), lambda i, j: (j, 0)),   # W2 d_ff slice
            pl.BlockSpec((1, H), lambda i, j: (0, 0)),    # b2
        ]
        out_specs = pl.BlockSpec((tm, H), lambda i, j: (i, 0))
        scratch_shapes = [pltpu.VMEM((tm, H), jnp.float32)]
        dim_sems = ("parallel", "arbitrary")

    out2d = pl.pallas_call(
        kernel,
        out_shape=jax.ShapeDtypeStruct((Mp, H), out_dtype),
        grid_spec=pltpu.PrefetchScalarGridSpec(
            num_scalar_prefetch=0,
            grid=grid,
            in_specs=in_specs,
            out_specs=out_specs,
            scratch_shapes=scratch_shapes,
        ),
        compiler_params=pltpu.CompilerParams(
            dimension_semantics=dim_sems,
            vmem_limit_bytes=vmem_limit,
        ),
    )(x2d, w1c, b1c, w2c, b2c)

    if Mp != M:
        out2d = out2d[:M]
    return out2d.reshape(B, S, H)


if __name__ == "__main__":
    # Small config: hidden_size=32, d_ff=128, batch=2, seq=8, dropout -> eval no-op.
    B, S, H, FF = 2, 8, 32, 128

    key = jax.random.PRNGKey(0)
    kx, kw1, kb1, kw2, kb2 = jax.random.split(key, 5)

    x = jax.random.normal(kx, (B, S, H), dtype=jnp.float32)

    # Deterministic Conv1d-like init, stored in (in, out) layout.
    bound1 = 1.0 / math.sqrt(H)
    w1 = jax.random.uniform(kw1, (H, FF), minval=-bound1, maxval=bound1, dtype=jnp.float32)
    b1 = jax.random.uniform(kb1, (FF,), minval=-bound1, maxval=bound1, dtype=jnp.float32)
    bound2 = 1.0 / math.sqrt(FF)
    w2 = jax.random.uniform(kw2, (FF, H), minval=-bound2, maxval=bound2, dtype=jnp.float32)
    b2 = jax.random.uniform(kb2, (H,), minval=-bound2, maxval=bound2, dtype=jnp.float32)

    out = poswise_ffn(x, w1, b1, w2, b2)   # default: exact erf GELU (PyTorch semantics)
    jax.block_until_ready(out)
    assert out.shape == (B, S, H)

    # Tight check: same bf16-operand / erf-GELU math in pure JAX.
    xb = x.reshape(-1, H).astype(jnp.bfloat16)
    h_ref = jnp.dot(xb, w1.astype(jnp.bfloat16), preferred_element_type=jnp.float32) + b1
    g_ref = 0.5 * h_ref * (1.0 + lax.erf(h_ref / jnp.sqrt(2.0)))
    y_ref = jnp.dot(g_ref.astype(jnp.bfloat16), w2.astype(jnp.bfloat16),
                    preferred_element_type=jnp.float32) + b2
    y_ref = y_ref.reshape(B, S, H)
    assert jnp.allclose(out, y_ref, atol=5e-3, rtol=5e-3), \
        float(jnp.max(jnp.abs(out - y_ref)))

    # Loose check against the exact f32 / erf-GELU (PyTorch-semantics) reference:
    # only bf16 rounding deviation expected.
    h32 = x @ w1 + b1
    g32 = 0.5 * h32 * (1.0 + lax.erf(h32 / jnp.sqrt(2.0)))
    y32 = g32 @ w2 + b2
    assert jnp.allclose(out, y32, atol=3e-2, rtol=3e-2), \
        float(jnp.max(jnp.abs(out - y32)))

    # Also exercise the tanh-GELU fast path once.
    out_tanh = poswise_ffn(x, w1, b1, w2, b2, approximate_gelu=True)
    jax.block_until_ready(out_tanh)
    assert jnp.allclose(out_tanh, y32, atol=6e-2, rtol=6e-2)

    print("KERNEL_OK")
</pallas_src>

<mosaic_0001>
module attributes {stable_mosaic.version = 11 : i64} {
  func.func @_ffn_kernel_resident(%arg0: i32, %arg1: memref<16x32xbf16, #tpu.memory_space<vmem>>, %arg2: memref<32x128xbf16, #tpu.memory_space<vmem>>, %arg3: memref<1x128xf32, #tpu.memory_space<vmem>>, %arg4: memref<128x32xbf16, #tpu.memory_space<vmem>>, %arg5: memref<1x32xf32, #tpu.memory_space<vmem>>, %arg6: memref<16x32xf32, #tpu.memory_space<vmem>>) attributes {dimension_semantics = [#tpu.dimension_semantics<parallel>], iteration_bounds = array<i64: 1>, scalar_prefetch = 0 : i64, scratch_operands = 0 : i64, tpu.core_type = #tpu.core_type<tc>, window_params = [{transform_indices = @transform_0, window_bounds = array<i64: 16, 32>}, {pipeline_mode = #tpu.pipeline_mode<synchronous>, transform_indices = @transform_1, window_bounds = array<i64: 32, 128>}, {pipeline_mode = #tpu.pipeline_mode<synchronous>, transform_indices = @transform_2, window_bounds = array<i64: 1, 128>}, {pipeline_mode = #tpu.pipeline_mode<synchronous>, transform_indices = @transform_3, window_bounds = array<i64: 128, 32>}, {pipeline_mode = #tpu.pipeline_mode<synchronous>, transform_indices = @transform_4, window_bounds = array<i64: 1, 32>}, {transform_indices = @transform_5, window_bounds = array<i64: 16, 32>}]} {
    %c0 = arith.constant 0 : index
    %c0_0 = arith.constant 0 : index
    %0 = vector.load %arg1[%c0, %c0_0] : memref<16x32xbf16, #tpu.memory_space<vmem>>, vector<16x32xbf16>
    %c0_1 = arith.constant 0 : index
    %c0_2 = arith.constant 0 : index
    %1 = vector.load %arg2[%c0_1, %c0_2] : memref<32x128xbf16, #tpu.memory_space<vmem>>, vector<32x128xbf16>
    %cst = arith.constant dense<0.000000e+00> : vector<16x128xf32>
    %2 = tpu.matmul %0, %1, %cst {dimension_numbers = #tpu.dot_dimension_numbers<[1], [0], [0], [1], [0, 0, 1, 1], [], []>} : vector<16x32xbf16>, vector<32x128xbf16>, vector<16x128xf32> -> vector<16x128xf32>
    %c0_3 = arith.constant 0 : index
    %c0_4 = arith.constant 0 : index
    %3 = vector.load %arg3[%c0_3, %c0_4] : memref<1x128xf32, #tpu.memory_space<vmem>>, vector<1x128xf32>
    %4 = vector.broadcast %3 : vector<1x128xf32> to vector<16x128xf32>
    %5 = arith.addf %2, %4 : vector<16x128xf32>
    %cst_5 = arith.constant 5.000000e-01 : f32
    %6 = vector.broadcast %cst_5 : f32 to vector<16x128xf32>
    %7 = arith.mulf %6, %5 : vector<16x128xf32>
    %cst_6 = arith.constant 0.707106769 : f32
    %8 = vector.broadcast %cst_6 : f32 to vector<16x128xf32>
    %9 = arith.mulf %5, %8 : vector<16x128xf32>
    %10 = math.erf %9 : vector<16x128xf32>
    %cst_7 = arith.constant 1.000000e+00 : f32
    %11 = vector.broadcast %cst_7 : f32 to vector<16x128xf32>
    %12 = arith.addf %11, %10 : vector<16x128xf32>
    %13 = arith.mulf %7, %12 : vector<16x128xf32>
    %14 = arith.truncf %13 : vector<16x128xf32> to vector<16x128xbf16>
    %c0_8 = arith.constant 0 : index
    %c0_9 = arith.constant 0 : index
    %15 = vector.load %arg4[%c0_8, %c0_9] : memref<128x32xbf16, #tpu.memory_space<vmem>>, vector<128x32xbf16>
    %cst_10 = arith.constant dense<0.000000e+00> : vector<16x32xf32>
    %16 = tpu.matmul %14, %15, %cst_10 {dimension_numbers = #tpu.dot_dimension_numbers<[1], [0], [0], [1], [0, 0, 1, 1], [], []>} : vector<16x128xbf16>, vector<128x32xbf16>, vector<16x32xf32> -> vector<16x32xf32>
    %c0_11 = arith.constant 0 : index
    %c0_12 = arith.constant 0 : index
    %17 = vector.load %arg5[%c0_11, %c0_12] : memref<1x32xf32, #tpu.memory_space<vmem>>, vector<1x32xf32>
    %18 = vector.broadcast %17 : vector<1x32xf32> to vector<16x32xf32>
    %19 = arith.addf %16, %18 : vector<16x32xf32>
    %c0_13 = arith.constant 0 : index
    %c0_14 = arith.constant 0 : index
    %20 = vector.load %arg6[%c0_13, %c0_14] : memref<16x32xf32, #tpu.memory_space<vmem>>, vector<16x32xf32>
    tpu.vector_store %arg6[%c0_13, %c0_14], %19 {strides = array<i32>} : memref<16x32xf32, #tpu.memory_space<vmem>>, vector<16x32xf32>,
    return
  }
  func.func @transform_0(%arg0: i32) -> (i32, i32) {
    %c0_i32 = arith.constant 0 : i32
    %c0_i32_0 = arith.constant 0 : i32
    return %arg0, %c0_i32 : i32, i32
  }
  func.func @transform_1(%arg0: i32) -> (i32, i32) {
    %c0_i32 = arith.constant 0 : i32
    %c0_i32_0 = arith.constant 0 : i32
    %c0_i32_1 = arith.constant 0 : i32
    return %c0_i32, %c0_i32_0 : i32, i32
  }
  func.func @transform_2(%arg0: i32) -> (i32, i32) {
    %c0_i32 = arith.constant 0 : i32
    %c0_i32_0 = arith.constant 0 : i32
    %c0_i32_1 = arith.constant 0 : i32
    return %c0_i32, %c0_i32_0 : i32, i32
  }
  func.func @transform_3(%arg0: i32) -> (i32, i32) {
    %c0_i32 = arith.constant 0 : i32
    %c0_i32_0 = arith.constant 0 : i32
    %c0_i32_1 = arith.constant 0 : i32
    return %c0_i32, %c0_i32_0 : i32, i32
  }
  func.func @transform_4(%arg0: i32) -> (i32, i32) {
    %c0_i32 = arith.constant 0 : i32
    %c0_i32_0 = arith.constant 0 : i32
    %c0_i32_1 = arith.constant 0 : i32
    return %c0_i32, %c0_i32_0 : i32, i32
  }
  func.func @transform_5(%arg0: i32) -> (i32, i32) {
    %c0_i32 = arith.constant 0 : i32
    %c0_i32_0 = arith.constant 0 : i32
    return %arg0, %c0_i32 : i32, i32
  }
}

</mosaic_0001>

<bundles_post_ra>
// kernel: tpu_custom_call.1
= control target key start
LH: loop header
LB: loop body
LE: loop exit
PB: predicated region body
PF: predicated region fallthrough
CT: control target
= control target key end

     0   :  { %v336_v1 = vmov 0.0   ;;  %vm337_vm0 = vmmov 0   ;;  %vm52_vm1 = vcmask 261120   ;;  %s425_s0 = inlined_call_operand.vmem [shape: bf16[16,32], index: 0, kind: input, shape index: {}]   ;;  %s426_s1 = inlined_call_operand.vmem [shape: bf16[32,128], index: 1, kind: input, shape index: {}]   ;;  %s427_s2 = inlined_call_operand.vmem [shape: f32[1,128], index: 2, kind: input, shape index: {}]   ;;  %s428_s3 = inlined_call_operand.vmem [shape: bf16[128,32], index: 3, kind: input, shape index: {}]   ;;  %s429_s4 = inlined_call_operand.vmem [shape: f32[1,32], index: 4, kind: input, shape index: {}]   ;;  %s430_s5 = inlined_call_operand.hbm [shape: f32[16,32], index: 5, kind: output, shape index: {}]  }
   0x1   :  { %v297_v0 = vld [vmem:[%s426_s1] sm:$0xff]   ;;  %264 = vmatprep.subr.bf16.mxu0 %v336_v1  ;;  %272 = vmatprep.subr.bf16.mxu1 %v336_v1  ;;  %v298_v2 = vld [vmem:[%s426_s1 + $0x8] sm:$0xff]  }
   0x2   :  { %265 = vmatpush3.bf16.msra.mxu0 %v297_v0  ;;  %268 = vmatprep.mubr.msk.bf16.mxu0 %vm337_vm0, %v336_v1  ;;  %v300_v3 = vld [vmem:[%s428_s3] sm:$0xff]   ;;  %v301_v5 = vld [vmem:[%s428_s3 + $0x8] sm:$0xff]  }
   0x3   :  { %266 = vmatprep.subr.bf16.mxu0 %v336_v1  ;;  %288 = vmatprep.mubr.msk.bf16.mxu1 %vm337_vm0, %v336_v1  ;;  %v299_v4 = vld [vmem:[%s425_s0] sm:$0xff]  }
   0x4   :  { %273 = vmatpush3.bf16.msra.mxu1 %v300_v3 }
   0x5   :  { %274 = vmatprep.subr.bf16.mxu1 %v336_v1 }
   0x6   :  { %267 = vmatpush3.bf16.msra.mxu0 %v298_v2 }
   0x8   :  { %275 = vmatpush3.bf16.msra.mxu1 %v301_v5 }
   0x9   :  { %269 = vmatmul.mubr.msk.bf16.vlgmr.msra.gmra.mrb[0].mxu0 %vm52_vm1, %v299_v4 }
   0xa   :  { %10 = vsyncpa [#allocation3], 0  ;;  %276 = vmatprep.subr.bf16.mxu1 %v336_v1  ;;  %v302_v6 = vld [vmem:[%s428_s3 + $0x10] sm:$0xff]   ;;  %v303_v7 = vld [vmem:[%s428_s3 + $0x18] sm:$0xff]   ;;  %s338_s15 = smov [#allocation2]  }
   0xb   :  { %v304_v8 = vld [vmem:[%s428_s3 + $0x20] sm:$0xff]   ;;  %v305_v9 = vld [vmem:[%s428_s3 + $0x28] sm:$0xff]   ;;  %v306_v10 = vld [vmem:[%s428_s3 + $0x30] sm:$0xff]   ;;  %s227_s16 = sshll.u32 %s338_s15, 4  ;;  %s228_s16 = int_to_ptr.vmem [resolvable:$true] %s227_s16 }
   0xc   :  { %277 = vmatpush3.bf16.msra.mxu1 %v302_v6  ;;  %v307_v11 = vld [vmem:[%s428_s3 + $0x38] sm:$0xff]   ;;  %v238_v12 = vld [vmem:[%s427_s2] ss:$0 sm:$0xff]  ;;  %s312_s17 = scalar_lea.vmem %s228_s16, 256  ;;  %p317_p1 = scmp.lt.s32.totalorder %s228_s16, %s228_s16 }
   0xd   :  { %278 = vmatprep.subr.bf16.mxu1 %v336_v1  ;;  %v243_v30 = vld [vmem:[%s429_s4] ss:$0 sm:$0xff]  ;;  %p313_p0 = scmp.ne.s32.totalorder %s228_s16, %s312_s17  ;;  %p318_p2 = scmp.lt.s32.totalorder %s312_s17, %s312_s17 }
   0xf   :  { %p319_p3 = por %p318_p2, %p317_p1 }
  0x10   :  { %279 = vmatpush3.bf16.msra.mxu1 %v303_v7 }
  0x11   :  { %280 = vmatprep.subr.bf16.mxu1 %v336_v1  ;;  %p320_p4 = pnand %p319_p3, %p313_p0 }
  0x14   :  { %281 = vmatpush3.bf16.msra.mxu1 %v304_v8 }
  0x15   :  { %282 = vmatprep.subr.bf16.mxu1 %v336_v1 }
  0x18   :  { %283 = vmatpush3.bf16.msra.mxu1 %v305_v9 }
  0x19   :  { %284 = vmatprep.subr.bf16.mxu1 %v336_v1 }
  0x1c   :  { %285 = vmatpush3.bf16.msra.mxu1 %v306_v10 }
  0x1d   :  { %286 = vmatprep.subr.bf16.mxu1 %v336_v1 }
  0x20   :  { %287 = vmatpush3.bf16.msra.mxu1 %v307_v11 }
  0xdc   :  { %v90_v13 = vpop.f32.mrb[0].mxu0 }
  0xdd   :  { %v91_v14 = vadd.f32 %v238_v12, %v90_v13  ;;  %v270_v15 = vpop.f32.mrb[1].mxu0 }
  0xde   :  { %v93_v16 = vpop.f32.mrb[2].mxu0 }
  0xdf   :  { %v99_v17 = vmul.f32 0.70710677, %v91_v14  ;;  %v94_v18 = vadd.f32 %v238_v12, %v93_v16  ;;  %v271_v19 = vpop.f32.mrb[3].mxu0  ;;  %v97_v24 = vmul.f32 0.5, %v91_v14 }
  0xe1   :  { %308 = verf.f32 %v99_v17  ;;  %v100_v20 = vmul.f32 0.70710677, %v94_v18  ;;  %v98_v25 = vmul.f32 0.5, %v94_v18 }
  0xe3   :  { %310 = verf.f32 %v100_v20 }
  0xeb   :  { %v309_v21 = vpop.eup %308 }
  0xec   :  { %v103_v22 = vadd.f32 1.0, %v309_v21 }
  0xed   :  { %v311_v23 = vpop.eup %310 }
  0xee   :  { %v104_v26 = vadd.f32 1.0, %v311_v23  ;;  %v105_v27 = vmul.f32 %v103_v22, %v97_v24 }
  0xf0   :  { %v106_v28 = vmul.f32 %v104_v26, %v98_v25 }
  0xf2   :  { %v107_v29 = vpack.c.bf16 %v106_v28, %v105_v27 }
  0xf4   :  { %289 = vmatmul.mubr.bf16.vlgmr.msra.gmra.mrb[0].mxu1 %v107_v29 }
 0x1c7   :  { %v213_v31 = vpop.f32.mrb[0].mxu1 }
 0x1c8   :  { %v214_v32 = vadd.f32 %v243_v30, %v213_v31  ;;  %v290_v33 = vpop.f32.mrb[1].mxu1 }
 0x1c9   :  { %v216_v34 = vpop.f32.mrb[2].mxu1 }
 0x1ca   :  { %220 = vst.msk [vmem:[#allocation2] sm:$0xff] %vm52_vm1, %v214_v32  ;;  %v217_v35 = vadd.f32 %v243_v30, %v216_v34  ;;  %v291_v36 = vpop.f32.mrb[3].mxu1 }
 0x1cc   :  { %221 = vst.msk [vmem:[#allocation2 + $0x8] sm:$0xff] %vm52_vm1, %v217_v35 }
 0x1cd   :  { %323 = shalt.err (!%p320_p4)
}
 0x1ce   :  { %s324_s19 = scalar_lea.hbm %s430_s5, 256 }
 0x1cf   :  { %p325_p5 = scmp.ne.s32.totalorder %s430_s5, %s324_s19  ;;  %p328_p6 = scmp.lt.u32.totalorder %s324_s19, %s430_s5 }
 0x1d1   :  { %p330_p7 = pnand %p328_p6, %p325_p5 }
 0x1d3   :  { %333 = shalt.err (!%p330_p7)
}
 0x1d4   :  { %s339_s24 = smov 128   ;;  %s340_s25 = smov 8  }
 0x1d5   :  { %233 = dma.vmem_to_hbm [thread:$0]  %s228_s16, 256, %s430_s5, [#allocation3], %s339_s24, %s339_s24, %s340_s25  }
 0x1d6   :  { %334 = dma.done.wait [#allocation3], 256  }
 0x1d7   :  { %335 = vsyncadd [#allocation3], 4294967040 }
 0x1d8   :  { %237 = vsyncpa [#allocation3], 1 }

</bundles_post_ra>
